<compile_context>
chip_gen: v6e
topology: v6e:2x2x1
jax: 0.10.0
libtpu: 0.0.40
codegen_flags: <defaults>
</compile_context>

<pallas_src>
import functools

import jax
import jax.numpy as jnp
from jax import lax
from jax.experimental import pallas as pl
from jax.experimental.pallas import tpu as pltpu

LANE = 128
SUBLANE = 8
BLOCK_ROWS = 8192       # 8192 x 128 x 4B = 4 MiB per f32 input block
CHUNK_ROWS = 1024       # in-kernel working set: 1024 x 128 x 4B = 512 KiB
NCORES = 2              # megacore split (v7x); harmless on single-core chips
VMEM_LIMIT_BYTES = 48 * 1024 * 1024


def _accumulate(x, t, xt_ref, xx_ref, tt_ref):
    """Fold an f32 (chunk_rows, 128) tile into the (1, 8, 128) accumulators."""
    g = x.shape[0] // SUBLANE

    def fold(v):
        # axis-0 sum over the (g, 8, 128) view is pure VPU adds across vregs —
        # no cross-lane XLU work in the hot loop.
        return jnp.sum(v.reshape(g, SUBLANE, LANE), axis=0, keepdims=True)

    xt_ref[...] += fold(x * t)
    xx_ref[...] += fold(x * x)
    tt_ref[...] += fold(t * t)


def _dice_kernel(x_ref, t_ref, xt_ref, xx_ref, tt_ref, *,
                 block_rows, chunk_rows, blocks_per_core, valid_rows,
                 tail_exists, dups_exist):
    p = pl.program_id(0)    # core / partial-sum slot ("parallel")
    j = pl.program_id(1)    # sequential reduction axis ("arbitrary")

    @pl.when(j == 0)
    def _():
        xt_ref[...] = jnp.zeros_like(xt_ref)
        xx_ref[...] = jnp.zeros_like(xx_ref)
        tt_ref[...] = jnp.zeros_like(tt_ref)

    row0 = (p * blocks_per_core + j) * block_rows   # first global row of block

    def chunk_body(r, masked):
        x = x_ref[pl.ds(r, chunk_rows), :].astype(jnp.float32)
        t = t_ref[pl.ds(r, chunk_rows), :].astype(jnp.float32)
        if masked:
            # Cold path: only the single ragged tail block builds the iota and
            # selects.  jnp.where (not multiply) so unspecified NaN/Inf in the
            # overhang cannot leak into the sums.
            row = jax.lax.broadcasted_iota(jnp.int32, (chunk_rows, LANE), 0) + (row0 + r)
            ok = row < valid_rows
            x = jnp.where(ok, x, 0.0)
            t = jnp.where(ok, t, 0.0)
        _accumulate(x, t, xt_ref, xx_ref, tt_ref)

    def run_block(masked):
        nchunks = block_rows // chunk_rows
        if nchunks == 1:
            chunk_body(0, masked)
        else:
            def body(c, carry):
                chunk_body(pl.multiple_of(c * chunk_rows, chunk_rows), masked)
                return carry
            lax.fori_loop(0, nchunks, body, 0)

    if not tail_exists and not dups_exist:
        # Static fast path: every block is full and unique — no masking at all.
        run_block(masked=False)
    else:
        is_full = row0 + block_rows <= valid_rows

        @pl.when(is_full)
        def _():
            run_block(masked=False)

        if tail_exists:
            is_tail = jnp.logical_and(row0 < valid_rows, jnp.logical_not(is_full))

            @pl.when(is_tail)
            def _():
                run_block(masked=True)
        # Clamped duplicate blocks (row0 >= valid_rows) are skipped entirely.


def dice_loss(inputs, targets, smooth=1.0):
    """Pallas implementation of DiceLoss.forward. inputs/targets: NCHW (any shape)."""
    assert inputs.shape == targets.shape

    x = inputs.reshape(-1)      # keep native dtype; cast to f32 happens in-kernel
    t = targets.reshape(-1)
    n = x.shape[0]

    # Sublane packing factor (f32: 8 rows/vreg, bf16: 16, int8/fp8: 32).
    pack = max(max(1, 4 // jnp.dtype(inputs.dtype).itemsize),
               max(1, 4 // jnp.dtype(targets.dtype).itemsize))

    # Layout glue: reshape to (rows, 128).  Large inputs only need n % 128 == 0;
    # tiny inputs are padded up to a full packed tile so the single block stays
    # dense.  Padding is zeros (sum neutral) and at most `multiple - 1` elems.
    tiny = n < BLOCK_ROWS * LANE
    multiple = SUBLANE * pack * LANE if tiny else LANE
    pad = (-n) % multiple
    if pad:
        x = jnp.pad(x, (0, pad))
        t = jnp.pad(t, (0, pad))
    rows = (n + pad) // LANE
    x2d = x.reshape(rows, LANE)
    t2d = t.reshape(rows, LANE)

    block_rows = min(BLOCK_ROWS, rows)                       # multiple of 8
    chunk_rows = CHUNK_ROWS if block_rows == BLOCK_ROWS else block_rows
    num_blocks = pl.cdiv(rows, block_rows)
    ncores = min(NCORES, num_blocks)
    blocks_per_core = pl.cdiv(num_blocks, ncores)

    tail_exists = (rows % block_rows) != 0                   # static
    dups_exist = ncores * blocks_per_core > num_blocks       # static

    def in_map(p, j):
        # Clamp so the DMA never walks past the last block; duplicate and
        # overhanging blocks are skipped / masked inside the kernel.
        return (jnp.minimum(p * blocks_per_core + j, num_blocks - 1), 0)

    out_map = lambda p, j: (p, 0, 0)
    acc_shape = jax.ShapeDtypeStruct((ncores, SUBLANE, LANE), jnp.float32)

    kernel = functools.partial(
        _dice_kernel,
        block_rows=block_rows,
        chunk_rows=chunk_rows,
        blocks_per_core=blocks_per_core,
        valid_rows=rows,
        tail_exists=tail_exists,
        dups_exist=dups_exist,
    )

    xt_p, xx_p, tt_p = pl.pallas_call(
        kernel,
        out_shape=(acc_shape, acc_shape, acc_shape),
        grid_spec=pltpu.PrefetchScalarGridSpec(
            num_scalar_prefetch=0,
            grid=(ncores, blocks_per_core),
            in_specs=[
                pl.BlockSpec((block_rows, LANE), in_map),
                pl.BlockSpec((block_rows, LANE), in_map),
            ],
            out_specs=[
                pl.BlockSpec((1, SUBLANE, LANE), out_map),
                pl.BlockSpec((1, SUBLANE, LANE), out_map),
                pl.BlockSpec((1, SUBLANE, LANE), out_map),
            ],
        ),
        compiler_params=pltpu.CompilerParams(
            dimension_semantics=("parallel", "arbitrary"),
            vmem_limit_bytes=VMEM_LIMIT_BYTES,
        ),
    )(x2d, t2d)

    # Final cross-lane reduction of 3 x (ncores, 8, 128) partials + the dice
    # formula in plain JAX — one tiny fused epilogue, negligible next to the
    # streamed HBM traffic.
    inter = jnp.sum(xt_p)
    sx = jnp.sum(xx_p)
    st = jnp.sum(tt_p)
    smooth = jnp.float32(smooth)
    return 1.0 - (2.0 * inter + smooth) / (sx + st + smooth)


def dice_loss_ref(inputs, targets, smooth=1.0):
    x = inputs.astype(jnp.float32).reshape(-1)
    t = targets.astype(jnp.float32).reshape(-1)
    inter = jnp.sum(x * t)
    return 1.0 - (2.0 * inter + smooth) / (jnp.sum(x * x) + jnp.sum(t * t) + smooth)


if __name__ == "__main__":
    key = jax.random.PRNGKey(0)
    k1, k2, k3, k4, k5, k6 = jax.random.split(key, 6)

    # 1) Primary check: small NCHW shape, n a multiple of 128 (no padding path).
    shape = (2, 4, 16, 16)
    inputs = jax.nn.sigmoid(jax.random.normal(k1, shape, dtype=jnp.float32))
    targets = (jax.random.uniform(k2, shape) > 0.5).astype(jnp.float32)
    out = jax.block_until_ready(dice_loss(inputs, targets, smooth=1.0))
    ref = dice_loss_ref(inputs, targets, smooth=1.0)
    assert jnp.allclose(out, ref, atol=1e-5, rtol=1e-5), (out, ref)

    # 2) Ragged element count -> exercises the tiny-input zero-pad path.
    shape2 = (1, 3, 13, 7)
    inputs2 = jax.nn.sigmoid(jax.random.normal(k3, shape2, dtype=jnp.float32))
    targets2 = (jax.random.uniform(k4, shape2) > 0.5).astype(jnp.float32)
    out2 = jax.block_until_ready(dice_loss(inputs2, targets2, smooth=1.0))
    ref2 = dice_loss_ref(inputs2, targets2, smooth=1.0)
    assert jnp.allclose(out2, ref2, atol=1e-5, rtol=1e-5), (out2, ref2)

    # 3) Multi-block input (rows > BLOCK_ROWS, rows % BLOCK_ROWS != 0):
    #    exercises the chunked interior fast path, the masked ragged tail
    #    block, and the two-slot parallel axis.
    shape3 = (4, 4, 256, 260)
    inputs3 = jax.nn.sigmoid(jax.random.normal(k5, shape3, dtype=jnp.float32))
    targets3 = (jax.random.uniform(k6, shape3) > 0.5).astype(jnp.float32)
    out3 = jax.block_until_ready(dice_loss(inputs3, targets3, smooth=1.0))
    ref3 = dice_loss_ref(inputs3, targets3, smooth=1.0)
    assert jnp.allclose(out3, ref3, atol=1e-4, rtol=1e-4), (out3, ref3)

    # 4) bf16 inputs: exercises the native-dtype DMA + in-kernel f32 cast and
    #    the dtype-aware (16-row) pad multiple.
    inputs4 = inputs.astype(jnp.bfloat16)
    targets4 = targets.astype(jnp.bfloat16)
    out4 = jax.block_until_ready(dice_loss(inputs4, targets4, smooth=1.0))
    ref4 = dice_loss_ref(inputs4, targets4, smooth=1.0)
    assert jnp.allclose(out4, ref4, atol=1e-5, rtol=1e-5), (out4, ref4)

    print("KERNEL_OK")
</pallas_src>

<mosaic_0001>
module attributes {stable_mosaic.version = 11 : i64} {
  func.func @_dice_kernel(%arg0: i32, %arg1: i32, %arg2: memref<16x128xf32, #tpu.memory_space<vmem>>, %arg3: memref<16x128xf32, #tpu.memory_space<vmem>>, %arg4: memref<1x8x128xf32, #tpu.memory_space<vmem>>, %arg5: memref<1x8x128xf32, #tpu.memory_space<vmem>>, %arg6: memref<1x8x128xf32, #tpu.memory_space<vmem>>) attributes {dimension_semantics = [#tpu.dimension_semantics<parallel>, #tpu.dimension_semantics<arbitrary>], iteration_bounds = array<i64: 1, 1>, scalar_prefetch = 0 : i64, scratch_operands = 0 : i64, tpu.core_type = #tpu.core_type<tc>, window_params = [{transform_indices = @transform_0, window_bounds = array<i64: 16, 128>}, {transform_indices = @transform_1, window_bounds = array<i64: 16, 128>}, {transform_indices = @transform_2, window_bounds = array<i64: 1, 8, 128>}, {transform_indices = @transform_3, window_bounds = array<i64: 1, 8, 128>}, {transform_indices = @transform_4, window_bounds = array<i64: 1, 8, 128>}]} {
    %c0_i32 = arith.constant 0 : i32
    %0 = arith.cmpi eq, %arg1, %c0_i32 : i32
    %1 = arith.extui %0 : i1 to i32
    %c0_i32_0 = arith.constant 0 : i32
    %2 = arith.cmpi ne, %1, %c0_i32_0 : i32
    scf.if %2 {
      %cst_24 = arith.constant 0.000000e+00 : f32
      %26 = vector.broadcast %cst_24 : f32 to vector<1x8x128xf32>
      %c0_25 = arith.constant 0 : index
      %c0_26 = arith.constant 0 : index
      %c0_27 = arith.constant 0 : index
      %27 = vector.load %arg4[%c0_25, %c0_26, %c0_27] : memref<1x8x128xf32, #tpu.memory_space<vmem>>, vector<1x8x128xf32>
      tpu.vector_store %arg4[%c0_25, %c0_26, %c0_27], %26 {strides = array<i32>} : memref<1x8x128xf32, #tpu.memory_space<vmem>>, vector<1x8x128xf32>,
      %cst_28 = arith.constant 0.000000e+00 : f32
      %28 = vector.broadcast %cst_28 : f32 to vector<1x8x128xf32>
      %c0_29 = arith.constant 0 : index
      %c0_30 = arith.constant 0 : index
      %c0_31 = arith.constant 0 : index
      %29 = vector.load %arg5[%c0_29, %c0_30, %c0_31] : memref<1x8x128xf32, #tpu.memory_space<vmem>>, vector<1x8x128xf32>
      tpu.vector_store %arg5[%c0_29, %c0_30, %c0_31], %28 {strides = array<i32>} : memref<1x8x128xf32, #tpu.memory_space<vmem>>, vector<1x8x128xf32>,
      %cst_32 = arith.constant 0.000000e+00 : f32
      %30 = vector.broadcast %cst_32 : f32 to vector<1x8x128xf32>
      %c0_33 = arith.constant 0 : index
      %c0_34 = arith.constant 0 : index
      %c0_35 = arith.constant 0 : index
      %31 = vector.load %arg6[%c0_33, %c0_34, %c0_35] : memref<1x8x128xf32, #tpu.memory_space<vmem>>, vector<1x8x128xf32>
      tpu.vector_store %arg6[%c0_33, %c0_34, %c0_35], %30 {strides = array<i32>} : memref<1x8x128xf32, #tpu.memory_space<vmem>>, vector<1x8x128xf32>,
    } else {
    }
    %c0 = arith.constant 0 : index
    %c0_1 = arith.constant 0 : index
    %3 = vector.load %arg2[%c0, %c0_1] : memref<16x128xf32, #tpu.memory_space<vmem>>, vector<16x128xf32>
    %c0_2 = arith.constant 0 : index
    %c0_3 = arith.constant 0 : index
    %4 = vector.load %arg3[%c0_2, %c0_3] : memref<16x128xf32, #tpu.memory_space<vmem>>, vector<16x128xf32>
    %c0_4 = arith.constant 0 : index
    %c0_5 = arith.constant 0 : index
    %c0_6 = arith.constant 0 : index
    %5 = vector.load %arg4[%c0_4, %c0_5, %c0_6] : memref<1x8x128xf32, #tpu.memory_space<vmem>>, vector<1x8x128xf32>
    %6 = arith.mulf %3, %4 : vector<16x128xf32>
    %7 = vector.shape_cast %6 : vector<16x128xf32> to vector<2x8x128xf32>
    %cst = arith.constant dense<0.000000e+00> : vector<8x128xf32>
    %8 = vector.multi_reduction <add>, %7, %cst [0] : vector<2x8x128xf32> to vector<8x128xf32>
    %9 = vector.shape_cast %8 : vector<8x128xf32> to vector<1x8x128xf32>
    %10 = arith.addf %5, %9 : vector<1x8x128xf32>
    %c0_7 = arith.constant 0 : index
    %c0_8 = arith.constant 0 : index
    %c0_9 = arith.constant 0 : index
    %11 = vector.load %arg4[%c0_7, %c0_8, %c0_9] : memref<1x8x128xf32, #tpu.memory_space<vmem>>, vector<1x8x128xf32>
    tpu.vector_store %arg4[%c0_7, %c0_8, %c0_9], %10 {strides = array<i32>} : memref<1x8x128xf32, #tpu.memory_space<vmem>>, vector<1x8x128xf32>,
    %c0_10 = arith.constant 0 : index
    %c0_11 = arith.constant 0 : index
    %c0_12 = arith.constant 0 : index
    %12 = vector.load %arg5[%c0_10, %c0_11, %c0_12] : memref<1x8x128xf32, #tpu.memory_space<vmem>>, vector<1x8x128xf32>
    %13 = arith.mulf %3, %3 : vector<16x128xf32>
    %14 = vector.shape_cast %13 : vector<16x128xf32> to vector<2x8x128xf32>
    %cst_13 = arith.constant dense<0.000000e+00> : vector<8x128xf32>
    %15 = vector.multi_reduction <add>, %14, %cst_13 [0] : vector<2x8x128xf32> to vector<8x128xf32>
    %16 = vector.shape_cast %15 : vector<8x128xf32> to vector<1x8x128xf32>
    %17 = arith.addf %12, %16 : vector<1x8x128xf32>
    %c0_14 = arith.constant 0 : index
    %c0_15 = arith.constant 0 : index
    %c0_16 = arith.constant 0 : index
    %18 = vector.load %arg5[%c0_14, %c0_15, %c0_16] : memref<1x8x128xf32, #tpu.memory_space<vmem>>, vector<1x8x128xf32>
    tpu.vector_store %arg5[%c0_14, %c0_15, %c0_16], %17 {strides = array<i32>} : memref<1x8x128xf32, #tpu.memory_space<vmem>>, vector<1x8x128xf32>,
    %c0_17 = arith.constant 0 : index
    %c0_18 = arith.constant 0 : index
    %c0_19 = arith.constant 0 : index
    %19 = vector.load %arg6[%c0_17, %c0_18, %c0_19] : memref<1x8x128xf32, #tpu.memory_space<vmem>>, vector<1x8x128xf32>
    %20 = arith.mulf %4, %4 : vector<16x128xf32>
    %21 = vector.shape_cast %20 : vector<16x128xf32> to vector<2x8x128xf32>
    %cst_20 = arith.constant dense<0.000000e+00> : vector<8x128xf32>
    %22 = vector.multi_reduction <add>, %21, %cst_20 [0] : vector<2x8x128xf32> to vector<8x128xf32>
    %23 = vector.shape_cast %22 : vector<8x128xf32> to vector<1x8x128xf32>
    %24 = arith.addf %19, %23 : vector<1x8x128xf32>
    %c0_21 = arith.constant 0 : index
    %c0_22 = arith.constant 0 : index
    %c0_23 = arith.constant 0 : index
    %25 = vector.load %arg6[%c0_21, %c0_22, %c0_23] : memref<1x8x128xf32, #tpu.memory_space<vmem>>, vector<1x8x128xf32>
    tpu.vector_store %arg6[%c0_21, %c0_22, %c0_23], %24 {strides = array<i32>} : memref<1x8x128xf32, #tpu.memory_space<vmem>>, vector<1x8x128xf32>,
    return
  }
  func.func @transform_0(%arg0: i32, %arg1: i32) -> (i32, i32) {
    %c1_i32 = arith.constant 1 : i32
    %0 = arith.muli %arg0, %c1_i32 : i32
    %1 = arith.addi %0, %arg1 : i32
    %c0_i32 = arith.constant 0 : i32
    %2 = arith.minsi %1, %c0_i32 : i32
    %c0_i32_0 = arith.constant 0 : i32
    %c0_i32_1 = arith.constant 0 : i32
    return %2, %c0_i32_0 : i32, i32
  }
  func.func @transform_1(%arg0: i32, %arg1: i32) -> (i32, i32) {
    %c1_i32 = arith.constant 1 : i32
    %0 = arith.muli %arg0, %c1_i32 : i32
    %1 = arith.addi %0, %arg1 : i32
    %c0_i32 = arith.constant 0 : i32
    %2 = arith.minsi %1, %c0_i32 : i32
    %c0_i32_0 = arith.constant 0 : i32
    %c0_i32_1 = arith.constant 0 : i32
    return %2, %c0_i32_0 : i32, i32
  }
  func.func @transform_2(%arg0: i32, %arg1: i32) -> (i32, i32, i32) {
    %c0_i32 = arith.constant 0 : i32
    %c0_i32_0 = arith.constant 0 : i32
    %c0_i32_1 = arith.constant 0 : i32
    return %arg0, %c0_i32, %c0_i32_0 : i32, i32, i32
  }
  func.func @transform_3(%arg0: i32, %arg1: i32) -> (i32, i32, i32) {
    %c0_i32 = arith.constant 0 : i32
    %c0_i32_0 = arith.constant 0 : i32
    %c0_i32_1 = arith.constant 0 : i32
    return %arg0, %c0_i32, %c0_i32_0 : i32, i32, i32
  }
  func.func @transform_4(%arg0: i32, %arg1: i32) -> (i32, i32, i32) {
    %c0_i32 = arith.constant 0 : i32
    %c0_i32_0 = arith.constant 0 : i32
    %c0_i32_1 = arith.constant 0 : i32
    return %arg0, %c0_i32, %c0_i32_0 : i32, i32, i32
  }
}

</mosaic_0001>

<bundles_post_ra>
// kernel: tpu_custom_call.1
= control target key start
LH: loop header
LB: loop body
LE: loop exit
PB: predicated region body
PF: predicated region fallthrough
CT: control target
= control target key end

     0   :  { %10 = vsyncpa [#allocation3], 0  ;;  %s303_s0 = inlined_call_operand.hbm [shape: f32[16,128], index: 0, kind: input, shape index: {}]   ;;  %s304_s1 = inlined_call_operand.hbm [shape: f32[16,128], index: 1, kind: input, shape index: {}]   ;;  %s305_s2 = inlined_call_operand.hbm [shape: f32[1,8,128], index: 2, kind: output, shape index: {0}]   ;;  %s306_s3 = inlined_call_operand.hbm [shape: f32[1,8,128], index: 3, kind: output, shape index: {1}]   ;;  %s307_s4 = inlined_call_operand.hbm [shape: f32[1,8,128], index: 4, kind: output, shape index: {2}]  }
   0x1   :  { %11 = vsyncpa [#allocation6], 0 }
   0x2   :  { %12 = vsyncpa [#allocation4], 0 }
   0x3   :  { %13 = vsyncpa [#allocation9], 0  ;;  %s256_s15 = smov [#allocation2]  }
   0x4   :  { %s25_s16 = sshll.u32 %s256_s15, 4  ;;  %s26_s16 = int_to_ptr.vmem [resolvable:$true] %s25_s16 }
   0x5   :  { %s156_s17 = scalar_lea.vmem %s26_s16, 256  ;;  %p161_p1 = scmp.lt.s32.totalorder %s26_s16, %s26_s16 }
   0x6   :  { %p157_p0 = scmp.ne.s32.totalorder %s26_s16, %s156_s17  ;;  %p162_p2 = scmp.lt.s32.totalorder %s156_s17, %s156_s17 }
   0x8   :  { %p163_p3 = por %p162_p2, %p161_p1 }
   0xa   :  { %p164_p4 = pnand %p163_p3, %p157_p0 }
   0xc   :  { %167 = shalt.err (!%p164_p4)
}
   0xd   :  { %s257_s18 = smov 128   ;;  %s258_s19 = smov 8  }
   0xe   :  { %31 = dma.hbm_to_vmem [thread:$0]  %s303_s0, 256, %s26_s16, [#allocation3], %s257_s18, %s257_s18, %s258_s19  }
   0xf   :  { %s259_s22 = smov [#allocation5]  }
  0x10   :  { %s43_s23 = sshll.u32 %s259_s22, 4  ;;  %s44_s23 = int_to_ptr.vmem [resolvable:$true] %s43_s23 }
  0x11   :  { %s176_s24 = scalar_lea.vmem %s44_s23, 256  ;;  %p181_p6 = scmp.lt.s32.totalorder %s44_s23, %s44_s23 }
  0x12   :  { %p177_p5 = scmp.ne.s32.totalorder %s44_s23, %s176_s24  ;;  %p182_p7 = scmp.lt.s32.totalorder %s176_s24, %s176_s24 }
  0x14   :  { %p183_p8 = por %p182_p7, %p181_p6 }
  0x16   :  { %p184_p9 = pnand %p183_p8, %p177_p5 }
  0x18   :  { %187 = shalt.err (!%p184_p9)
}
  0x19   :  { %49 = dma.hbm_to_vmem [thread:$0]  %s304_s1, 256, %s44_s23, [#allocation6], %s257_s18, %s257_s18, %s258_s19  }
  0x1a   :  { %248 = dma.done.wait [#allocation3], 256  }
  0x1b   :  { %249 = vsyncadd [#allocation3], 4294967040 }
  0x1c   :  { %250 = dma.done.wait [#allocation6], 256  }
  0x1d   :  { %251 = vsyncadd [#allocation6], 4294967040  ;;  %v71_v0 = vld [vmem:[#allocation2] sm:$0xff]  ;;  %v72_v1 = vld [vmem:[#allocation2 + $0x8] sm:$0xff]  ;;  %s260_s0 = smov [#allocation8]   ;;  %s261_s28 = smov [#allocation7]  }
  0x1e   :  { %v73_v2 = vld [vmem:[#allocation5] sm:$0xff]  ;;  %v82_v3 = vmul.f32 %v71_v0, %v71_v0  ;;  %v83_v4 = vmul.f32 %v72_v1, %v72_v1  ;;  %v74_v5 = vld [vmem:[#allocation5 + $0x8] sm:$0xff]  ;;  %s109_s27 = sshll.u32 %s260_s0, 4  ;;  %s99_s29 = sshll.u32 %s261_s28, 4  ;;  %s110_s27 = int_to_ptr.vmem [resolvable:$true] %s109_s27  ;;  %s100_s29 = int_to_ptr.vmem [resolvable:$true] %s99_s29 }
  0x1f   :  { %v76_v6 = vmul.f32 %v73_v2, %v71_v0  ;;  %v88_v7 = vmul.f32 %v73_v2, %v73_v2  ;;  %v77_v8 = vmul.f32 %v74_v5, %v72_v1  ;;  %v89_v9 = vmul.f32 %v74_v5, %v74_v5  ;;  %s262_s1 = smov [#allocation10]   ;;  %s188_s5 = scalar_lea.vmem %s110_s27, 128 }
  0x20   :  { %v84_v10 = vadd.f32 %v83_v4, %v82_v3  ;;  %s119_s30 = sshll.u32 %s262_s1, 4  ;;  %p189_p10 = scmp.ne.s32.totalorder %s110_s27, %s188_s5  ;;  %s120_s30 = int_to_ptr.vmem [resolvable:$true] %s119_s30 }
  0x21   :  { %v78_v11 = vadd.f32 %v77_v8, %v76_v6  ;;  %v90_v12 = vadd.f32 %v89_v9, %v88_v7  ;;  %p193_p11 = scmp.lt.s32.totalorder %s110_s27, %s110_s27  ;;  %p194_p12 = scmp.lt.s32.totalorder %s188_s5, %s188_s5 }
  0x22   :  { %86 = vst [vmem:[#allocation8] sm:$0xff] %v84_v10 }
  0x23   :  { %80 = vst [vmem:[#allocation7] sm:$0xff] %v78_v11  ;;  %92 = vst [vmem:[#allocation10] sm:$0xff] %v90_v12  ;;  %p195_p13 = por %p194_p12, %p193_p11 }
  0x25   :  { %p196_p0 = pnand %p195_p13, %p189_p10 }
  0x27   :  { %199 = shalt.err (!%p196_p0)
}
  0x28   :  { %112 = dma.vmem_to_hbm [thread:$0]  %s110_s27, 128, %s306_s3, [#allocation9]  }
  0x29   :  { %s208_s8 = scalar_lea.vmem %s100_s29, 128  ;;  %p213_p2 = scmp.lt.s32.totalorder %s100_s29, %s100_s29 }
  0x2a   :  { %p209_p1 = scmp.ne.s32.totalorder %s100_s29, %s208_s8  ;;  %p214_p3 = scmp.lt.s32.totalorder %s208_s8, %s208_s8 }
  0x2c   :  { %p215_p4 = por %p214_p3, %p213_p2 }
  0x2e   :  { %p216_p5 = pnand %p215_p4, %p209_p1 }
  0x30   :  { %219 = shalt.err (!%p216_p5)
}
  0x31   :  { %102 = dma.vmem_to_hbm [thread:$0]  %s100_s29, 128, %s305_s2, [#allocation4]  }
  0x32   :  { %s228_s11 = scalar_lea.vmem %s120_s30, 128  ;;  %p233_p7 = scmp.lt.s32.totalorder %s120_s30, %s120_s30 }
  0x33   :  { %p229_p6 = scmp.ne.s32.totalorder %s120_s30, %s228_s11  ;;  %p234_p8 = scmp.lt.s32.totalorder %s228_s11, %s228_s11 }
  0x35   :  { %p235_p9 = por %p234_p8, %p233_p7 }
  0x37   :  { %p236_p10 = pnand %p235_p9, %p229_p6 }
  0x39   :  { %239 = shalt.err (!%p236_p10)
}
  0x3a   :  { %122 = dma.vmem_to_hbm [thread:$0]  %s120_s30, 128, %s307_s4, [#allocation9]  }
  0x3b   :  { %252 = dma.done.wait [#allocation4], 128  }
  0x3c   :  { %253 = vsyncadd [#allocation4], 4294967168 }
  0x3d   :  { %254 = dma.done.wait [#allocation9], 256  }
  0x3e   :  { %255 = vsyncadd [#allocation9], 4294967040 }
  0x3f   :  { %132 = vsyncpa [#allocation3], 1 }
  0x40   :  { %133 = vsyncpa [#allocation6], 1 }
  0x41   :  { %134 = vsyncpa [#allocation4], 1 }
  0x42   :  { %135 = vsyncpa [#allocation9], 1 }

</bundles_post_ra>
